<compile_context>
chip_gen: v5e
topology: v5e:2x2
jax: 0.10.0
libtpu: 0.0.40
codegen_flags: <defaults>
</compile_context>

<pallas_src>
import jax
import jax.numpy as jnp
from jax import lax
from jax.experimental import pallas as pl
from jax.experimental.pallas import tpu as pltpu


# ------------------------------ fused kernel --------------------------------

def make_fused_kernel(plan):
    """plan: sequence of "conv" / "pool" strings (compile-time layer structure)."""

    def kernel(*refs):
        x_ref = refs[0]
        o_ref = refs[-1]
        prm = refs[1:-1]          # conv (w, b) pairs ..., post_w, post_b, final_w, final_b

        h = x_ref[0].astype(jnp.float32)      # (T, Cin) — one sequence per grid step
        pi = 0
        for kind in plan:
            T = h.shape[0]
            if kind == "conv":
                w_ref = prm[pi]               # (3, Cin, Cout)  (eval-mode BN folded in)
                b_ref = prm[pi + 1]           # (1, Cout)
                pi += 2
                # Banded shift matrices give the k=0 / k=2 taps with implicit zero
                # padding at the sequence edges (no jnp.pad, no cross-sequence leak).
                r = lax.broadcasted_iota(jnp.int32, (T, T), 0)
                c = lax.broadcasted_iota(jnp.int32, (T, T), 1)
                L = jnp.where(c == r - 1, 1.0, 0.0)   # row t selects h[t-1] (row 0 -> 0)
                R = jnp.where(c == r + 1, 1.0, 0.0)   # row t selects h[t+1] (row T-1 -> 0)
                left = jnp.dot(L, h, preferred_element_type=jnp.float32)
                right = jnp.dot(R, h, preferred_element_type=jnp.float32)
                acc = (jnp.dot(left, w_ref[0], preferred_element_type=jnp.float32)
                       + jnp.dot(h, w_ref[1], preferred_element_type=jnp.float32)
                       + jnp.dot(right, w_ref[2], preferred_element_type=jnp.float32)
                       + b_ref[...])
                h = jnp.maximum(acc, 0.0)             # ReLU (BN already folded)
            else:                                     # MaxPool1d(kernel=2, stride=2)
                To = T // 2                           # floor => PyTorch ceil_mode=False
                r = lax.broadcasted_iota(jnp.int32, (To, T), 0)
                c = lax.broadcasted_iota(jnp.int32, (To, T), 1)
                S0 = jnp.where(c == 2 * r, 1.0, 0.0)      # picks rows 0,2,4,...
                S1 = jnp.where(c == 2 * r + 1, 1.0, 0.0)  # picks rows 1,3,5,...
                h = jnp.maximum(
                    jnp.dot(S0, h, preferred_element_type=jnp.float32),
                    jnp.dot(S1, h, preferred_element_type=jnp.float32))

        # post_extract_proj
        post_w, post_b = prm[pi], prm[pi + 1]
        h = jnp.dot(h, post_w[...], preferred_element_type=jnp.float32) + post_b[...]
        # dropout_features (p=0.1): eval-mode identity.
        # TODO(synk): get_mask is not defined in the provided source; treated as identity.
        # TODO(synk): TransformerEncoder / enc_kwargs not provided; treated as identity.
        final_w, final_b = prm[pi + 2], prm[pi + 3]
        logits = jnp.dot(h, final_w[...], preferred_element_type=jnp.float32) + final_b[...]
        o_ref[0] = logits.astype(o_ref.dtype)

    return kernel


# ------------------------------ forward wrapper ------------------------------

def mini_hubert_forward(params, x, x_lengths, length_scale):
    """MiniHubert.forward with pesudo_label=None (eval mode). Single fused pallas_call."""
    B, T, Cin = x.shape
    T_out = T // length_scale
    n_class = params["final_w"].shape[-1]

    inputs = [x]
    in_specs = [pl.BlockSpec((1, T, Cin), lambda i: (i, 0, 0))]
    plan = []
    for kind, p in params["layers"]:
        plan.append(kind)
        if kind == "conv":
            w, b = p
            inputs += [w, b.reshape(1, -1)]
            # Constant index_maps: weight/bias blocks are DMA'd once and revisited
            # (not re-copied) across sequential grid steps.
            in_specs += [pl.BlockSpec(w.shape, lambda i: (0, 0, 0)),
                         pl.BlockSpec((1, w.shape[-1]), lambda i: (0, 0))]
    inputs += [params["post_w"], params["post_b"].reshape(1, -1),
               params["final_w"], params["final_b"].reshape(1, -1)]
    in_specs += [pl.BlockSpec(params["post_w"].shape, lambda i: (0, 0)),
                 pl.BlockSpec((1, params["post_w"].shape[-1]), lambda i: (0, 0)),
                 pl.BlockSpec(params["final_w"].shape, lambda i: (0, 0)),
                 pl.BlockSpec((1, params["final_w"].shape[-1]), lambda i: (0, 0))]

    logits = pl.pallas_call(
        make_fused_kernel(plan),
        out_shape=jax.ShapeDtypeStruct((B, T_out, n_class), x.dtype),
        grid=(B,),
        in_specs=in_specs,
        out_specs=pl.BlockSpec((1, T_out, n_class), lambda i: (i, 0, 0)),
        compiler_params=pltpu.CompilerParams(dimension_semantics=("parallel",)),
    )(*inputs)

    x_lengths = x_lengths // length_scale
    # pesudo_label is None -> final_ln / codebook attention / cross_entropy skipped.
    loss = None
    return logits, x_lengths, loss


# --------------------------- parameters / reference --------------------------

def build_params(key, features_cfg, model_dim):
    """Deterministic synthetic parameters matching MiniHubert.__init__ shapes."""
    params = {"layers": []}
    in_c = features_cfg[0]
    bn_eps = 1e-5
    for layer_type in features_cfg:
        if layer_type == 'M':
            params["layers"].append(("pool", None))
        else:
            out_c = layer_type
            key, kw = jax.random.split(key)
            # kaiming_normal_(mode='fan_out', nonlinearity='relu'): std = sqrt(2/(Cout*K))
            std = (2.0 / (out_c * 3)) ** 0.5
            w = jax.random.normal(kw, (3, in_c, out_c), jnp.float32) * std
            b = jnp.zeros((out_c,), jnp.float32)
            # BatchNorm1d (eval mode, default stats: mean=0, var=1, gamma=1, beta=0)
            # folded into conv weight/bias. NOTE: with trained running stats the fold
            # must use them instead.
            scale = 1.0 / jnp.sqrt(1.0 + bn_eps)
            params["layers"].append(("conv", (w * scale, b * scale)))
            in_c = out_c
    key, k1, k2 = jax.random.split(key, 3)
    # nn.Linear init: normal(0, 0.02) weight, zero bias. Stored as (Din, Dout).
    params["post_w"] = jax.random.normal(k1, (features_cfg[-1], model_dim), jnp.float32) * 0.02
    params["post_b"] = jnp.zeros((model_dim,), jnp.float32)
    params["final_w"] = jax.random.normal(k2, (model_dim, features_cfg[0]), jnp.float32) * 0.02
    params["final_b"] = jnp.zeros((features_cfg[0],), jnp.float32)
    return params


def _reference_forward(params, x, x_lengths, length_scale):
    """Pure-JAX reference (XLA) of the same eval-mode forward, for a sanity check."""
    hp_prec = lax.Precision.HIGHEST
    h = x
    for kind, p in params["layers"]:
        if kind == "pool":
            B, T, C = h.shape
            To = T // 2
            h = jnp.max(h[:, :2 * To].reshape(B, To, 2, C), axis=2)
        else:
            w, b = p
            T = h.shape[1]
            hp = jnp.pad(h, ((0, 0), (1, 1), (0, 0)))
            acc = sum(jnp.einsum('btc,cd->btd', hp[:, k:k + T], w[k], precision=hp_prec)
                      for k in range(3)) + b
            h = jnp.maximum(acc, 0.0)
    h = jnp.einsum('btc,cd->btd', h, params["post_w"], precision=hp_prec) + params["post_b"]
    logits = jnp.einsum('btc,cd->btd', h, params["final_w"], precision=hp_prec) + params["final_b"]
    return logits, x_lengths // length_scale


# ---------------------------------- main -------------------------------------

if __name__ == "__main__":
    features_cfg = [4, 32, 'M', 32]   # cfg[0] = input channels = final_proj out dim
    model_dim = 32
    B, T = 2, 16
    length_scale = 2 ** features_cfg.count('M')

    key = jax.random.PRNGKey(0)
    kx, kp = jax.random.split(key)
    x = jax.random.normal(kx, (B, T, features_cfg[0]), jnp.float32)
    x_lengths = jnp.array([16, 12], dtype=jnp.int32)

    params = build_params(kp, features_cfg, model_dim)

    logits, out_lengths, loss = mini_hubert_forward(params, x, x_lengths, length_scale)
    jax.block_until_ready((logits, out_lengths))

    assert logits.shape == (B, T // length_scale, features_cfg[0])
    assert out_lengths.shape == (B,)
    assert loss is None

    # Numerical sanity check against the pure-JAX reference of the same math.
    ref_logits, ref_lengths = _reference_forward(params, x, x_lengths, length_scale)
    jax.block_until_ready((ref_logits, ref_lengths))
    assert bool(jnp.allclose(logits, ref_logits, atol=2e-2, rtol=2e-2))
    assert bool(jnp.array_equal(out_lengths, ref_lengths))

    print("KERNEL_OK")
</pallas_src>

<mosaic_0001>
module attributes {stable_mosaic.version = 11 : i64} {
  func.func @kernel(%arg0: i32, %arg1: memref<1x16x4xf32, #tpu.memory_space<vmem>>, %arg2: memref<3x4x4xf32, #tpu.memory_space<vmem>>, %arg3: memref<1x4xf32, #tpu.memory_space<vmem>>, %arg4: memref<3x4x32xf32, #tpu.memory_space<vmem>>, %arg5: memref<1x32xf32, #tpu.memory_space<vmem>>, %arg6: memref<3x32x32xf32, #tpu.memory_space<vmem>>, %arg7: memref<1x32xf32, #tpu.memory_space<vmem>>, %arg8: memref<32x32xf32, #tpu.memory_space<vmem>>, %arg9: memref<1x32xf32, #tpu.memory_space<vmem>>, %arg10: memref<32x4xf32, #tpu.memory_space<vmem>>, %arg11: memref<1x4xf32, #tpu.memory_space<vmem>>, %arg12: memref<1x8x4xf32, #tpu.memory_space<vmem>>) attributes {dimension_semantics = [#tpu.dimension_semantics<parallel>], iteration_bounds = array<i64: 2>, scalar_prefetch = 0 : i64, scratch_operands = 0 : i64, tpu.core_type = #tpu.core_type<tc>, window_params = [{transform_indices = @transform_0, window_bounds = array<i64: 1, 16, 4>}, {pipeline_mode = #tpu.pipeline_mode<synchronous>, transform_indices = @transform_1, window_bounds = array<i64: 3, 4, 4>}, {pipeline_mode = #tpu.pipeline_mode<synchronous>, transform_indices = @transform_2, window_bounds = array<i64: 1, 4>}, {pipeline_mode = #tpu.pipeline_mode<synchronous>, transform_indices = @transform_3, window_bounds = array<i64: 3, 4, 32>}, {pipeline_mode = #tpu.pipeline_mode<synchronous>, transform_indices = @transform_4, window_bounds = array<i64: 1, 32>}, {pipeline_mode = #tpu.pipeline_mode<synchronous>, transform_indices = @transform_5, window_bounds = array<i64: 3, 32, 32>}, {pipeline_mode = #tpu.pipeline_mode<synchronous>, transform_indices = @transform_6, window_bounds = array<i64: 1, 32>}, {pipeline_mode = #tpu.pipeline_mode<synchronous>, transform_indices = @transform_7, window_bounds = array<i64: 32, 32>}, {pipeline_mode = #tpu.pipeline_mode<synchronous>, transform_indices = @transform_8, window_bounds = array<i64: 1, 32>}, {pipeline_mode = #tpu.pipeline_mode<synchronous>, transform_indices = @transform_9, window_bounds = array<i64: 32, 4>}, {pipeline_mode = #tpu.pipeline_mode<synchronous>, transform_indices = @transform_10, window_bounds = array<i64: 1, 4>}, {transform_indices = @transform_11, window_bounds = array<i64: 1, 8, 4>}]} {
    %c0 = arith.constant 0 : index
    %c0_0 = arith.constant 0 : index
    %c0_1 = arith.constant 0 : index
    %0 = vector.load %arg1[%c0, %c0_0, %c0_1] : memref<1x16x4xf32, #tpu.memory_space<vmem>>, vector<1x16x4xf32>
    %1 = vector.shape_cast %0 : vector<1x16x4xf32> to vector<16x4xf32>
    %2 = tpu.iota {dimensions = array<i32: 0>} : vector<16x16xi32>
    %3 = tpu.iota {dimensions = array<i32: 1>} : vector<16x16xi32>
    %c1_i32 = arith.constant 1 : i32
    %4 = vector.broadcast %c1_i32 : i32 to vector<16x16xi32>
    %5 = arith.subi %2, %4 : vector<16x16xi32>
    %6 = arith.cmpi eq, %3, %5 : vector<16x16xi32>
    %cst = arith.constant 1.000000e+00 : f32
    %cst_2 = arith.constant 0.000000e+00 : f32
    %7 = vector.broadcast %cst : f32 to vector<16x16xf32>
    %8 = vector.broadcast %cst_2 : f32 to vector<16x16xf32>
    %9 = arith.select %6, %7, %8 : vector<16x16xi1>, vector<16x16xf32>
    %c1_i32_3 = arith.constant 1 : i32
    %10 = vector.broadcast %c1_i32_3 : i32 to vector<16x16xi32>
    %11 = arith.addi %2, %10 : vector<16x16xi32>
    %12 = arith.cmpi eq, %3, %11 : vector<16x16xi32>
    %cst_4 = arith.constant 1.000000e+00 : f32
    %cst_5 = arith.constant 0.000000e+00 : f32
    %13 = vector.broadcast %cst_4 : f32 to vector<16x16xf32>
    %14 = vector.broadcast %cst_5 : f32 to vector<16x16xf32>
    %15 = arith.select %12, %13, %14 : vector<16x16xi1>, vector<16x16xf32>
    %cst_6 = arith.constant dense<0.000000e+00> : vector<16x4xf32>
    %16 = tpu.matmul %9, %1, %cst_6 {dimension_numbers = #tpu.dot_dimension_numbers<[1], [0], [0], [1], [0, 0, 1, 1], [], []>} : vector<16x16xf32>, vector<16x4xf32>, vector<16x4xf32> -> vector<16x4xf32>
    %cst_7 = arith.constant dense<0.000000e+00> : vector<16x4xf32>
    %17 = tpu.matmul %15, %1, %cst_7 {dimension_numbers = #tpu.dot_dimension_numbers<[1], [0], [0], [1], [0, 0, 1, 1], [], []>} : vector<16x16xf32>, vector<16x4xf32>, vector<16x4xf32> -> vector<16x4xf32>
    %c0_8 = arith.constant 0 : index
    %c0_9 = arith.constant 0 : index
    %c0_10 = arith.constant 0 : index
    %18 = vector.load %arg2[%c0_8, %c0_9, %c0_10] : memref<3x4x4xf32, #tpu.memory_space<vmem>>, vector<1x4x4xf32>
    %19 = vector.shape_cast %18 : vector<1x4x4xf32> to vector<4x4xf32>
    %cst_11 = arith.constant dense<0.000000e+00> : vector<16x4xf32>
    %20 = tpu.matmul %16, %19, %cst_11 {dimension_numbers = #tpu.dot_dimension_numbers<[1], [0], [0], [1], [0, 0, 1, 1], [], []>} : vector<16x4xf32>, vector<4x4xf32>, vector<16x4xf32> -> vector<16x4xf32>
    %c1 = arith.constant 1 : index
    %c0_12 = arith.constant 0 : index
    %c0_13 = arith.constant 0 : index
    %21 = vector.load %arg2[%c1, %c0_12, %c0_13] : memref<3x4x4xf32, #tpu.memory_space<vmem>>, vector<1x4x4xf32>
    %22 = vector.shape_cast %21 : vector<1x4x4xf32> to vector<4x4xf32>
    %cst_14 = arith.constant dense<0.000000e+00> : vector<16x4xf32>
    %23 = tpu.matmul %1, %22, %cst_14 {dimension_numbers = #tpu.dot_dimension_numbers<[1], [0], [0], [1], [0, 0, 1, 1], [], []>} : vector<16x4xf32>, vector<4x4xf32>, vector<16x4xf32> -> vector<16x4xf32>
    %24 = arith.addf %20, %23 : vector<16x4xf32>
    %c2 = arith.constant 2 : index
    %c0_15 = arith.constant 0 : index
    %c0_16 = arith.constant 0 : index
    %25 = vector.load %arg2[%c2, %c0_15, %c0_16] : memref<3x4x4xf32, #tpu.memory_space<vmem>>, vector<1x4x4xf32>
    %26 = vector.shape_cast %25 : vector<1x4x4xf32> to vector<4x4xf32>
    %cst_17 = arith.constant dense<0.000000e+00> : vector<16x4xf32>
    %27 = tpu.matmul %17, %26, %cst_17 {dimension_numbers = #tpu.dot_dimension_numbers<[1], [0], [0], [1], [0, 0, 1, 1], [], []>} : vector<16x4xf32>, vector<4x4xf32>, vector<16x4xf32> -> vector<16x4xf32>
    %28 = arith.addf %24, %27 : vector<16x4xf32>
    %c0_18 = arith.constant 0 : index
    %c0_19 = arith.constant 0 : index
    %29 = vector.load %arg3[%c0_18, %c0_19] : memref<1x4xf32, #tpu.memory_space<vmem>>, vector<1x4xf32>
    %30 = vector.broadcast %29 : vector<1x4xf32> to vector<16x4xf32>
    %31 = arith.addf %28, %30 : vector<16x4xf32>
    %cst_20 = arith.constant 0.000000e+00 : f32
    %32 = vector.broadcast %cst_20 : f32 to vector<16x4xf32>
    %33 = arith.maximumf %31, %32 : vector<16x4xf32>
    %34 = tpu.iota {dimensions = array<i32: 0>} : vector<16x16xi32>
    %35 = tpu.iota {dimensions = array<i32: 1>} : vector<16x16xi32>
    %c1_i32_21 = arith.constant 1 : i32
    %36 = vector.broadcast %c1_i32_21 : i32 to vector<16x16xi32>
    %37 = arith.subi %34, %36 : vector<16x16xi32>
    %38 = arith.cmpi eq, %35, %37 : vector<16x16xi32>
    %cst_22 = arith.constant 1.000000e+00 : f32
    %cst_23 = arith.constant 0.000000e+00 : f32
    %39 = vector.broadcast %cst_22 : f32 to vector<16x16xf32>
    %40 = vector.broadcast %cst_23 : f32 to vector<16x16xf32>
    %41 = arith.select %38, %39, %40 : vector<16x16xi1>, vector<16x16xf32>
    %c1_i32_24 = arith.constant 1 : i32
    %42 = vector.broadcast %c1_i32_24 : i32 to vector<16x16xi32>
    %43 = arith.addi %34, %42 : vector<16x16xi32>
    %44 = arith.cmpi eq, %35, %43 : vector<16x16xi32>
    %cst_25 = arith.constant 1.000000e+00 : f32
    %cst_26 = arith.constant 0.000000e+00 : f32
    %45 = vector.broadcast %cst_25 : f32 to vector<16x16xf32>
    %46 = vector.broadcast %cst_26 : f32 to vector<16x16xf32>
    %47 = arith.select %44, %45, %46 : vector<16x16xi1>, vector<16x16xf32>
    %cst_27 = arith.constant dense<0.000000e+00> : vector<16x4xf32>
    %48 = tpu.matmul %41, %33, %cst_27 {dimension_numbers = #tpu.dot_dimension_numbers<[1], [0], [0], [1], [0, 0, 1, 1], [], []>} : vector<16x16xf32>, vector<16x4xf32>, vector<16x4xf32> -> vector<16x4xf32>
    %cst_28 = arith.constant dense<0.000000e+00> : vector<16x4xf32>
    %49 = tpu.matmul %47, %33, %cst_28 {dimension_numbers = #tpu.dot_dimension_numbers<[1], [0], [0], [1], [0, 0, 1, 1], [], []>} : vector<16x16xf32>, vector<16x4xf32>, vector<16x4xf32> -> vector<16x4xf32>
    %c0_29 = arith.constant 0 : index
    %c0_30 = arith.constant 0 : index
    %c0_31 = arith.constant 0 : index
    %50 = vector.load %arg4[%c0_29, %c0_30, %c0_31] : memref<3x4x32xf32, #tpu.memory_space<vmem>>, vector<1x4x32xf32>
    %51 = vector.shape_cast %50 : vector<1x4x32xf32> to vector<4x32xf32>
    %cst_32 = arith.constant dense<0.000000e+00> : vector<16x32xf32>
    %52 = tpu.matmul %48, %51, %cst_32 {dimension_numbers = #tpu.dot_dimension_numbers<[1], [0], [0], [1], [0, 0, 1, 1], [], []>} : vector<16x4xf32>, vector<4x32xf32>, vector<16x32xf32> -> vector<16x32xf32>
    %c1_33 = arith.constant 1 : index
    %c0_34 = arith.constant 0 : index
    %c0_35 = arith.constant 0 : index
    %53 = vector.load %arg4[%c1_33, %c0_34, %c0_35] : memref<3x4x32xf32, #tpu.memory_space<vmem>>, vector<1x4x32xf32>
    %54 = vector.shape_cast %53 : vector<1x4x32xf32> to vector<4x32xf32>
    %cst_36 = arith.constant dense<0.000000e+00> : vector<16x32xf32>
    %55 = tpu.matmul %33, %54, %cst_36 {dimension_numbers = #tpu.dot_dimension_numbers<[1], [0], [0], [1], [0, 0, 1, 1], [], []>} : vector<16x4xf32>, vector<4x32xf32>, vector<16x32xf32> -> vector<16x32xf32>
    %56 = arith.addf %52, %55 : vector<16x32xf32>
    %c2_37 = arith.constant 2 : index
    %c0_38 = arith.constant 0 : index
    %c0_39 = arith.constant 0 : index
    %57 = vector.load %arg4[%c2_37, %c0_38, %c0_39] : memref<3x4x32xf32, #tpu.memory_space<vmem>>, vector<1x4x32xf32>
    %58 = vector.shape_cast %57 : vector<1x4x32xf32> to vector<4x32xf32>
    %cst_40 = arith.constant dense<0.000000e+00> : vector<16x32xf32>
    %59 = tpu.matmul %49, %58, %cst_40 {dimension_numbers = #tpu.dot_dimension_numbers<[1], [0], [0], [1], [0, 0, 1, 1], [], []>} : vector<16x4xf32>, vector<4x32xf32>, vector<16x32xf32> -> vector<16x32xf32>
    %60 = arith.addf %56, %59 : vector<16x32xf32>
    %c0_41 = arith.constant 0 : index
    %c0_42 = arith.constant 0 : index
    %61 = vector.load %arg5[%c0_41, %c0_42] : memref<1x32xf32, #tpu.memory_space<vmem>>, vector<1x32xf32>
    %62 = vector.broadcast %61 : vector<1x32xf32> to vector<16x32xf32>
    %63 = arith.addf %60, %62 : vector<16x32xf32>
    %cst_43 = arith.constant 0.000000e+00 : f32
    %64 = vector.broadcast %cst_43 : f32 to vector<16x32xf32>
    %65 = arith.maximumf %63, %64 : vector<16x32xf32>
    %66 = tpu.iota {dimensions = array<i32: 0>} : vector<8x16xi32>
    %67 = tpu.iota {dimensions = array<i32: 1>} : vector<8x16xi32>
    %c2_i32 = arith.constant 2 : i32
    %68 = vector.broadcast %c2_i32 : i32 to vector<8x16xi32>
    %69 = arith.muli %68, %66 : vector<8x16xi32>
    %70 = arith.cmpi eq, %67, %69 : vector<8x16xi32>
    %cst_44 = arith.constant 1.000000e+00 : f32
    %cst_45 = arith.constant 0.000000e+00 : f32
    %71 = vector.broadcast %cst_44 : f32 to vector<8x16xf32>
    %72 = vector.broadcast %cst_45 : f32 to vector<8x16xf32>
    %73 = arith.select %70, %71, %72 : vector<8x16xi1>, vector<8x16xf32>
    %c2_i32_46 = arith.constant 2 : i32
    %74 = vector.broadcast %c2_i32_46 : i32 to vector<8x16xi32>
    %75 = arith.muli %74, %66 : vector<8x16xi32>
    %c1_i32_47 = arith.constant 1 : i32
    %76 = vector.broadcast %c1_i32_47 : i32 to vector<8x16xi32>
    %77 = arith.addi %75, %76 : vector<8x16xi32>
    %78 = arith.cmpi eq, %67, %77 : vector<8x16xi32>
    %cst_48 = arith.constant 1.000000e+00 : f32
    %cst_49 = arith.constant 0.000000e+00 : f32
    %79 = vector.broadcast %cst_48 : f32 to vector<8x16xf32>
    %80 = vector.broadcast %cst_49 : f32 to vector<8x16xf32>
    %81 = arith.select %78, %79, %80 : vector<8x16xi1>, vector<8x16xf32>
    %cst_50 = arith.constant dense<0.000000e+00> : vector<8x32xf32>
    %82 = tpu.matmul %73, %65, %cst_50 {dimension_numbers = #tpu.dot_dimension_numbers<[1], [0], [0], [1], [0, 0, 1, 1], [], []>} : vector<8x16xf32>, vector<16x32xf32>, vector<8x32xf32> -> vector<8x32xf32>
    %cst_51 = arith.constant dense<0.000000e+00> : vector<8x32xf32>
    %83 = tpu.matmul %81, %65, %cst_51 {dimension_numbers = #tpu.dot_dimension_numbers<[1], [0], [0], [1], [0, 0, 1, 1], [], []>} : vector<8x16xf32>, vector<16x32xf32>, vector<8x32xf32> -> vector<8x32xf32>
    %84 = arith.maximumf %82, %83 : vector<8x32xf32>
    %85 = tpu.iota {dimensions = array<i32: 0>} : vector<8x8xi32>
    %86 = tpu.iota {dimensions = array<i32: 1>} : vector<8x8xi32>
    %c1_i32_52 = arith.constant 1 : i32
    %87 = vector.broadcast %c1_i32_52 : i32 to vector<8x8xi32>
    %88 = arith.subi %85, %87 : vector<8x8xi32>
    %89 = arith.cmpi eq, %86, %88 : vector<8x8xi32>
    %cst_53 = arith.constant 1.000000e+00 : f32
    %cst_54 = arith.constant 0.000000e+00 : f32
    %90 = vector.broadcast %cst_53 : f32 to vector<8x8xf32>
    %91 = vector.broadcast %cst_54 : f32 to vector<8x8xf32>
    %92 = arith.select %89, %90, %91 : vector<8x8xi1>, vector<8x8xf32>
    %c1_i32_55 = arith.constant 1 : i32
    %93 = vector.broadcast %c1_i32_55 : i32 to vector<8x8xi32>
    %94 = arith.addi %85, %93 : vector<8x8xi32>
    %95 = arith.cmpi eq, %86, %94 : vector<8x8xi32>
    %cst_56 = arith.constant 1.000000e+00 : f32
    %cst_57 = arith.constant 0.000000e+00 : f32
    %96 = vector.broadcast %cst_56 : f32 to vector<8x8xf32>
    %97 = vector.broadcast %cst_57 : f32 to vector<8x8xf32>
    %98 = arith.select %95, %96, %97 : vector<8x8xi1>, vector<8x8xf32>
    %cst_58 = arith.constant dense<0.000000e+00> : vector<8x32xf32>
    %99 = tpu.matmul %92, %84, %cst_58 {dimension_numbers = #tpu.dot_dimension_numbers<[1], [0], [0], [1], [0, 0, 1, 1], [], []>} : vector<8x8xf32>, vector<8x32xf32>, vector<8x32xf32> -> vector<8x32xf32>
    %cst_59 = arith.constant dense<0.000000e+00> : vector<8x32xf32>
    %100 = tpu.matmul %98, %84, %cst_59 {dimension_numbers = #tpu.dot_dimension_numbers<[1], [0], [0], [1], [0, 0, 1, 1], [], []>} : vector<8x8xf32>, vector<8x32xf32>, vector<8x32xf32> -> vector<8x32xf32>
    %c0_60 = arith.constant 0 : index
    %c0_61 = arith.constant 0 : index
    %c0_62 = arith.constant 0 : index
    %101 = vector.load %arg6[%c0_60, %c0_61, %c0_62] : memref<3x32x32xf32, #tpu.memory_space<vmem>>, vector<1x32x32xf32>
    %102 = vector.shape_cast %101 : vector<1x32x32xf32> to vector<32x32xf32>
    %cst_63 = arith.constant dense<0.000000e+00> : vector<8x32xf32>
    %103 = tpu.matmul %99, %102, %cst_63 {dimension_numbers = #tpu.dot_dimension_numbers<[1], [0], [0], [1], [0, 0, 1, 1], [], []>} : vector<8x32xf32>, vector<32x32xf32>, vector<8x32xf32> -> vector<8x32xf32>
    %c1_64 = arith.constant 1 : index
    %c0_65 = arith.constant 0 : index
    %c0_66 = arith.constant 0 : index
    %104 = vector.load %arg6[%c1_64, %c0_65, %c0_66] : memref<3x32x32xf32, #tpu.memory_space<vmem>>, vector<1x32x32xf32>
    %105 = vector.shape_cast %104 : vector<1x32x32xf32> to vector<32x32xf32>
    %cst_67 = arith.constant dense<0.000000e+00> : vector<8x32xf32>
    %106 = tpu.matmul %84, %105, %cst_67 {dimension_numbers = #tpu.dot_dimension_numbers<[1], [0], [0], [1], [0, 0, 1, 1], [], []>} : vector<8x32xf32>, vector<32x32xf32>, vector<8x32xf32> -> vector<8x32xf32>
    %107 = arith.addf %103, %106 : vector<8x32xf32>
    %c2_68 = arith.constant 2 : index
    %c0_69 = arith.constant 0 : index
    %c0_70 = arith.constant 0 : index
    %108 = vector.load %arg6[%c2_68, %c0_69, %c0_70] : memref<3x32x32xf32, #tpu.memory_space<vmem>>, vector<1x32x32xf32>
    %109 = vector.shape_cast %108 : vector<1x32x32xf32> to vector<32x32xf32>
    %cst_71 = arith.constant dense<0.000000e+00> : vector<8x32xf32>
    %110 = tpu.matmul %100, %109, %cst_71 {dimension_numbers = #tpu.dot_dimension_numbers<[1], [0], [0], [1], [0, 0, 1, 1], [], []>} : vector<8x32xf32>, vector<32x32xf32>, vector<8x32xf32> -> vector<8x32xf32>
    %111 = arith.addf %107, %110 : vector<8x32xf32>
    %c0_72 = arith.constant 0 : index
    %c0_73 = arith.constant 0 : index
    %112 = vector.load %arg7[%c0_72, %c0_73] : memref<1x32xf32, #tpu.memory_space<vmem>>, vector<1x32xf32>
    %113 = vector.broadcast %112 : vector<1x32xf32> to vector<8x32xf32>
    %114 = arith.addf %111, %113 : vector<8x32xf32>
    %cst_74 = arith.constant 0.000000e+00 : f32
    %115 = vector.broadcast %cst_74 : f32 to vector<8x32xf32>
    %116 = arith.maximumf %114, %115 : vector<8x32xf32>
    %c0_75 = arith.constant 0 : index
    %c0_76 = arith.constant 0 : index
    %117 = vector.load %arg8[%c0_75, %c0_76] : memref<32x32xf32, #tpu.memory_space<vmem>>, vector<32x32xf32>
    %cst_77 = arith.constant dense<0.000000e+00> : vector<8x32xf32>
    %118 = tpu.matmul %116, %117, %cst_77 {dimension_numbers = #tpu.dot_dimension_numbers<[1], [0], [0], [1], [0, 0, 1, 1], [], []>} : vector<8x32xf32>, vector<32x32xf32>, vector<8x32xf32> -> vector<8x32xf32>
    %c0_78 = arith.constant 0 : index
    %c0_79 = arith.constant 0 : index
    %119 = vector.load %arg9[%c0_78, %c0_79] : memref<1x32xf32, #tpu.memory_space<vmem>>, vector<1x32xf32>
    %120 = vector.broadcast %119 : vector<1x32xf32> to vector<8x32xf32>
    %121 = arith.addf %118, %120 : vector<8x32xf32>
    %c0_80 = arith.constant 0 : index
    %c0_81 = arith.constant 0 : index
    %122 = vector.load %arg10[%c0_80, %c0_81] : memref<32x4xf32, #tpu.memory_space<vmem>>, vector<32x4xf32>
    %cst_82 = arith.constant dense<0.000000e+00> : vector<8x4xf32>
    %123 = tpu.matmul %121, %122, %cst_82 {dimension_numbers = #tpu.dot_dimension_numbers<[1], [0], [0], [1], [0, 0, 1, 1], [], []>} : vector<8x32xf32>, vector<32x4xf32>, vector<8x4xf32> -> vector<8x4xf32>
    %c0_83 = arith.constant 0 : index
    %c0_84 = arith.constant 0 : index
    %124 = vector.load %arg11[%c0_83, %c0_84] : memref<1x4xf32, #tpu.memory_space<vmem>>, vector<1x4xf32>
    %125 = vector.broadcast %124 : vector<1x4xf32> to vector<8x4xf32>
    %126 = arith.addf %123, %125 : vector<8x4xf32>
    %c0_85 = arith.constant 0 : index
    %c0_86 = arith.constant 0 : index
    %c0_87 = arith.constant 0 : index
    %127 = vector.load %arg12[%c0_85, %c0_86, %c0_87] : memref<1x8x4xf32, #tpu.memory_space<vmem>>, vector<1x8x4xf32>
    %128 = vector.shape_cast %127 : vector<1x8x4xf32> to vector<8x4xf32>
    %129 = vector.shape_cast %126 : vector<8x4xf32> to vector<1x8x4xf32>
    tpu.vector_store %arg12[%c0_85, %c0_86, %c0_87], %129 {strides = array<i32>} : memref<1x8x4xf32, #tpu.memory_space<vmem>>, vector<1x8x4xf32>,
    return
  }
  func.func @transform_0(%arg0: i32) -> (i32, i32, i32) {
    %c0_i32 = arith.constant 0 : i32
    %c0_i32_0 = arith.constant 0 : i32
    %c0_i32_1 = arith.constant 0 : i32
    return %arg0, %c0_i32, %c0_i32_0 : i32, i32, i32
  }
  func.func @transform_1(%arg0: i32) -> (i32, i32, i32) {
    %c0_i32 = arith.constant 0 : i32
    %c0_i32_0 = arith.constant 0 : i32
    %c0_i32_1 = arith.constant 0 : i32
    %c0_i32_2 = arith.constant 0 : i32
    return %c0_i32, %c0_i32_0, %c0_i32_1 : i32, i32, i32
  }
  func.func @transform_2(%arg0: i32) -> (i32, i32) {
    %c0_i32 = arith.constant 0 : i32
    %c0_i32_0 = arith.constant 0 : i32
    %c0_i32_1 = arith.constant 0 : i32
    return %c0_i32, %c0_i32_0 : i32, i32
  }
  func.func @transform_3(%arg0: i32) -> (i32, i32, i32) {
    %c0_i32 = arith.constant 0 : i32
    %c0_i32_0 = arith.constant 0 : i32
    %c0_i32_1 = arith.constant 0 : i32
    %c0_i32_2 = arith.constant 0 : i32
    return %c0_i32, %c0_i32_0, %c0_i32_1 : i32, i32, i32
  }
  func.func @transform_4(%arg0: i32) -> (i32, i32) {
    %c0_i32 = arith.constant 0 : i32
    %c0_i32_0 = arith.constant 0 : i32
    %c0_i32_1 = arith.constant 0 : i32
    return %c0_i32, %c0_i32_0 : i32, i32
  }
  func.func @transform_5(%arg0: i32) -> (i32, i32, i32) {
    %c0_i32 = arith.constant 0 : i32
    %c0_i32_0 = arith.constant 0 : i32
    %c0_i32_1 = arith.constant 0 : i32
    %c0_i32_2 = arith.constant 0 : i32
    return %c0_i32, %c0_i32_0, %c0_i32_1 : i32, i32, i32
  }
  func.func @transform_6(%arg0: i32) -> (i32, i32) {
    %c0_i32 = arith.constant 0 : i32
    %c0_i32_0 = arith.constant 0 : i32
    %c0_i32_1 = arith.constant 0 : i32
    return %c0_i32, %c0_i32_0 : i32, i32
  }
  func.func @transform_7(%arg0: i32) -> (i32, i32) {
    %c0_i32 = arith.constant 0 : i32
    %c0_i32_0 = arith.constant 0 : i32
    %c0_i32_1 = arith.constant 0 : i32
    return %c0_i32, %c0_i32_0 : i32, i32
  }
  func.func @transform_8(%arg0: i32) -> (i32, i32) {
    %c0_i32 = arith.constant 0 : i32
    %c0_i32_0 = arith.constant 0 : i32
    %c0_i32_1 = arith.constant 0 : i32
    return %c0_i32, %c0_i32_0 : i32, i32
  }
  func.func @transform_9(%arg0: i32) -> (i32, i32) {
    %c0_i32 = arith.constant 0 : i32
    %c0_i32_0 = arith.constant 0 : i32
    %c0_i32_1 = arith.constant 0 : i32
    return %c0_i32, %c0_i32_0 : i32, i32
  }
  func.func @transform_10(%arg0: i32) -> (i32, i32) {
    %c0_i32 = arith.constant 0 : i32
    %c0_i32_0 = arith.constant 0 : i32
    %c0_i32_1 = arith.constant 0 : i32
    return %c0_i32, %c0_i32_0 : i32, i32
  }
  func.func @transform_11(%arg0: i32) -> (i32, i32, i32) {
    %c0_i32 = arith.constant 0 : i32
    %c0_i32_0 = arith.constant 0 : i32
    %c0_i32_1 = arith.constant 0 : i32
    return %arg0, %c0_i32, %c0_i32_0 : i32, i32, i32
  }
}

</mosaic_0001>

<bundles_post_ra>
// kernel: tpu_custom_call.1
= control target key start
LH: loop header
LB: loop body
LE: loop exit
PB: predicated region body
PF: predicated region fallthrough
CT: control target
= control target key end

     0   :  { %16 = vsyncpa [#allocation3], 0  ;;  %s1254_s17 = smov 0   ;;  %s1399_s0 = inlined_call_operand.vmem [shape: f32[2,16,4], index: 0, kind: input, shape index: {}]   ;;  %s1400_s1 = inlined_call_operand.vmem [shape: f32[3,4,4], index: 1, kind: input, shape index: {}]   ;;  %s1401_s2 = inlined_call_operand.vmem [shape: f32[1,4], index: 2, kind: input, shape index: {}]   ;;  %s1402_s3 = inlined_call_operand.vmem [shape: f32[3,4,32], index: 3, kind: input, shape index: {}]   ;;  %s1403_s4 = inlined_call_operand.vmem [shape: f32[1,32], index: 4, kind: input, shape index: {}]   ;;  %s1404_s5 = inlined_call_operand.hbm [shape: f32[3,32,32], index: 5, kind: input, shape index: {}]   ;;  %s1405_s6 = inlined_call_operand.vmem [shape: f32[1,32], index: 6, kind: input, shape index: {}]   ;;  %s1406_s7 = inlined_call_operand.vmem [shape: f32[32,32], index: 7, kind: input, shape index: {}]   ;;  %s1407_s8 = inlined_call_operand.vmem [shape: f32[1,32], index: 8, kind: input, shape index: {}]   ;;  %s1408_s9 = inlined_call_operand.vmem [shape: f32[32,4], index: 9, kind: input, shape index: {}]   ;;  %s1409_s10 = inlined_call_operand.vmem [shape: f32[1,4], index: 10, kind: input, shape index: {}]   ;;  %s1410_s11 = inlined_call_operand.vmem [shape: f32[2,8,4], index: 11, kind: output, shape index: {}]  }
   0x1 LB: > { %s312_s20 = sshll.u32 %s1404_s5, 4  ;;  %s1067_s21 = sadd.s32 4294967295, %s1188_s17   ;;  %s1188_s17 = sphi %s1254_s17, %s22_s17   ;;  %s313_s20 = int_to_ptr.hbm [resolvable:$true] %s312_s20 }
   0x2   : > { %p1069_p0 = scmp.ge.s32.totalorder %s1188_s17, 1  ;;  %p289_p1 = scmp.lt.s32.totalorder %s1188_s17, 3 }
   0x3   : > { %p1129_p2 = scmp.eq.s32.totalorder %s1067_s21, 0  ;;  %s1190_s22 = smov [#allocation2]  }
   0x4   : > { %p290_p3 = pnand %p1069_p0, %p289_p1  ;;  %s314_s23 = sshll.u32 %s1190_s22, 4  ;;  %s315_s23 = int_to_ptr.vmem [resolvable:$true] %s314_s23 }
   0x5   : > { %s1191_s24 = smov 128   ;;  %s1192_s25 = smov 8  }
   0x6   : > { %p1125_p4 = pneg %p290_p3  ;;  %353 = sbr.rel (%p290_p3) target bundleno = 1239 (0x4d7), region = 64 }
   0x8   : > { %p1126_p5 = pnand %p1129_p2, %p1125_p4 }
   0xa   : > { %1128 = dma.hbm_to_vmem [thread:$0]  (!%p1126_p5), %s313_s20, 1536, %s315_s23, [#allocation3], %s1191_s24, %s1191_s24, %s1192_s25  }
   0xb   : > { %1183 = dma.done.wait (%p1129_p2), [#allocation3], 1536  }
   0xc   : > { %1185 = vsyncadd (%p1129_p2), [#allocation3], 4294965760  ;;  %p393_p6 = scmp.lt.s32.totalorder %s1067_s21, 1  ;;  %v404_v0 = vlaneseq  ;;  %vm421_vm0 = vcmask 130048   ;;  %vm490_vm3 = vcmask 1043456   ;;  %vm483_vm4 = vcmask 31744  }
   0xd   : > { %v1193_v8 = vmov 0.0   ;;  %v1083_v11 = vld [vmem:[%s1400_s1 + $0x4] sm:$0xf]  ;;  %v480_v16 = vld [vmem:[%s1400_s1] sm:$0xf]  ;;  %v856_v63 = vld [vmem:[#allocation2 + $0x38] sm:$0xff] }
   0xe   : > { %s1412_s21 = smov (!%p393_p6, %s1067_s21), 1  ;;  %v1267_v1 = vshrl.u32 %v404_v0, 7  ;;  %v1269_v2 = vand.u32 127, %v404_v0  ;;  %1084 = vmatpush.msk.msra.mxu2 %vm490_vm3, %v1083_v11  ;;  %1087 = vmatpush.msk.msra.mxu3 %vm490_vm3, %v480_v16  ;;  %v1090_v17 = vld [vmem:[%s1400_s1 + $0x8] sm:$0xf]  ;;  %v855_v0 = vld [vmem:[#allocation2 + $0x30] sm:$0xff] }
   0xf   : > { %s1120_s26 = sshll.u32 %s1412_s21, 4  ;;  %v1098_v22 = vld [vmem:[%s1402_s3 + $0x4] sm:$0xf]  ;;  %v1143_v28 = vld [vmem:[%s1401_s2] ss:$0 sm:$0xff]  ;;  %vm803_vm9 = vcmask 64512  }
  0x10   : > { %v1077_v3 = vadd.s32 4294967295, %v1267_v1  ;;  %v415_v4 = vadd.s32 1, %v1267_v1  ;;  %s397_s29 = scalar_lea.vmem %s1399_s0, %s1120_s26  ;;  %v406_v5 = vadd.s32 8, %v1267_v1  ;;  %1091 = vmatpush.msk.msrb.mxu2 %vm490_vm3, %v1090_v17  ;;  %v639_v38 = vld [vmem:[%s1402_s3] sm:$0xf]  ;;  %v750_v48 = vmul.u32 2, %v1267_v1 }
  0x11   : > { %v403_v6 = vld [vmem:[%s397_s29 + $0x8] sm:$0xff]  ;;  %v402_v7 = vld [vmem:[%s397_s29] sm:$0xff]  ;;  %vm857_vm10 = vcmask 261120   ;;  %s1076_s13 = sshll.u32 %s1412_s21, 3 }
  0x12   : > { %vm411_vm1 = vcmp.eq.s32.totalorder %v1269_v2, %v1077_v3  ;;  %vm417_vm2 = vcmp.eq.s32.totalorder %v1269_v2, %v415_v4  ;;  %442 = vmatpush.msra.mxu0 %v403_v6  ;;  %471 = vmatpush.msra.mxu1 %v403_v6  ;;  %v1078_v12 = vadd.s32 4294967295, %v406_v5  ;;  %v416_v13 = vadd.s32 1, %v406_v5  ;;  %v1105_v39 = vld [vmem:[%s1402_s3 + $0x8] sm:$0xf]  ;;  %v1144_v53 = vld [vmem:[%s1403_s4] ss:$0 sm:$0xff]  ;;  %s401_s19 = scalar_lea.vmem %s1410_s11, %s1076_s13 }
  0x13   : > { %v1281_v9 = vsel %vm411_vm1, 1.0, %v1193_v8  ;;  %v1284_v10 = vsel %vm417_vm2, 1.0, %v1193_v8  ;;  %1085 = vmatmul.msk.f32.vlgmr.msra.gmra.mxu2 %vm483_vm4, %v402_v7  ;;  %v753_v55 = vadd.s32 1, %v750_v48  ;;  %vm751_vm7 = vcmp.eq.s32.totalorder %v1269_v2, %v750_v48  ;;  %v854_v1 = vld [vmem:[#allocation2 + $0x28] sm:$0xff]  ;;  %v851_v3 = vld [vmem:[#allocation2 + $0x18] sm:$0xff]  ;;  %v850_v4 = vld [vmem:[#allocation2 + $0x10] sm:$0xff] }
  0x14   : > { %443 = vmatpush.msra.mxu0 %v402_v7  ;;  %472 = vmatpush.msra.mxu1 %v402_v7  ;;  %vm412_vm5 = vcmp.eq.s32.totalorder %v1269_v2, %v1078_v12  ;;  %vm418_vm6 = vcmp.eq.s32.totalorder %v1269_v2, %v416_v13  ;;  %v752_v61 = vsel %vm751_vm7, 1.0, %v1193_v8  ;;  %v849_v5 = vld [vmem:[#allocation2 + $0x8] sm:$0xff]  ;;  %v848_v11 = vld [vmem:[#allocation2] sm:$0xff]  ;;  %v908_v12 = vld [vmem:[#allocation2 + $0x58] sm:$0xff] }
  0x15   : > { %1079 = vmatmul.msk.f32.vlgmr.msra.gmra.mxu0 %vm421_vm0, %v1281_v9  ;;  %1081 = vmatmul.msk.f32.vlgmr.msra.gmra.mxu1 %vm421_vm0, %v1284_v10  ;;  %v414_v14 = vsel %vm412_vm5, 1.0, %v1193_v8  ;;  %v420_v15 = vsel %vm418_vm6, 1.0, %v1193_v8  ;;  %vm754_vm8 = vcmp.eq.s32.totalorder %v1269_v2, %v753_v55  ;;  %v853_v2 = vld [vmem:[#allocation2 + $0x20] sm:$0xff]  ;;  %v907_v13 = vld [vmem:[#allocation2 + $0x50] sm:$0xff] }
  0x16   : > { %1099 = vmatpush.msk.msrb.mxu1 %vm490_vm3, %v1098_v22  ;;  %1102 = vmatpush.msk.msra.mxu2 %vm490_vm3, %v639_v38  ;;  %v755_v62 = vsel %vm754_vm8, 1.0, %v1193_v8 }
  0x1b   : > { %1086 = vmatmul.msk.f32.gmra.mxu2 %vm483_vm4, %v403_v6 }
  0x1d   : > { %1080 = vmatmul.msk.f32.gmra.mxu0 %vm421_vm0, %v414_v14  ;;  %1082 = vmatmul.msk.f32.gmra.mxu1 %vm421_vm0, %v420_v15 }
  0x92   : > { %v445_v18 = vpop.f32.mrf.mxu0  ;;  %v474_v19 = vpop.f32.mrf.mxu1 }
  0x93   : > { %1088 = vmatmul.msk.f32.vlgmr.msra.gmra.mxu3 %vm483_vm4, %v445_v18  ;;  %1092 = vmatmul.msk.f32.vlgmr.msrb.gmra.mxu2 %vm483_vm4, %v474_v19  ;;  %v940_v18 = vld [vmem:[%s1406_s7 + $0x8] sm:$0xff]  ;;  %v939_v19 = vld [vmem:[%s1406_s7] sm:$0xff] }
  0x94   : > { %873 = vmatpush.msrb.mxu2 %v856_v63 }
  0x96   : > { %v511_v23 = vpop.f32.mrf.mxu2  ;;  %874 = vmatpush.msrb.mxu2 %v855_v0 }
  0x98   : > { %875 = vmatpush.msrb.mxu2 %v854_v1 }
  0x9a   : > { %v448_v20 = vpop.f32.mrf.mxu0  ;;  %v477_v21 = vpop.f32.mrf.mxu1  ;;  %876 = vmatpush.msrb.mxu2 %v853_v2 }
  0x9b   : > { %1089 = vmatmul.msk.f32.gmra.mxu3 %vm483_vm4, %v448_v20  ;;  %1093 = vmatmul.msk.f32.gmra.mxu2 %vm483_vm4, %v477_v21  ;;  %v973_v20 = vld [vmem:[%s1408_s9 + $0x18] sm:$0xff]  ;;  %v972_v21 = vld [vmem:[%s1408_s9 + $0x10] sm:$0xff] }
  0x9e   : > { %v514_v24 = vpop.f32.mrf.mxu2 }
 0x116   : > { %v543_v25 = vpop.f32.mrf.mxu3  ;;  %v577_v26 = vpop.f32.mrf.mxu2 }
 0x117   : > { %v544_v27 = vadd.f32 %v543_v25, %v511_v23 }
 0x119   : > { %v583_v29 = vadd.f32 %v577_v26, %v544_v27  ;;  %v1145_v26 = vld [vmem:[%s1405_s6] ss:$0 sm:$0xff] }
 0x11b   : > { %v589_v30 = vadd.f32 %v1143_v28, %v583_v29 }
 0x11d   : > { %v591_v31 = vmax.f32 %v589_v30, 0.0  ;;  %v971_v30 = vld [vmem:[%s1408_s9 + $0x8] sm:$0xff] }
 0x11e   : > { %v546_v32 = vpop.f32.mrf.mxu3  ;;  %v580_v33 = vpop.f32.mrf.mxu2 }
 0x11f   : > { %v547_v34 = vadd.f32 %v546_v32, %v514_v24  ;;  %1100 = vmatmul.msk.f32.vlgmr.msrb.gmra.mxu1 %vm483_vm4, %v591_v31  ;;  %v1146_v32 = vld [vmem:[%s1407_s8] ss:$0 sm:$0xff] }
 0x121   : > { %v584_v35 = vadd.f32 %v580_v33, %v547_v34 }
 0x123   : > { %v590_v36 = vadd.f32 %v1143_v28, %v584_v35  ;;  %v1147_v35 = vld [vmem:[%s1409_s10] ss:$0 sm:$0xff] }
 0x125   : > { %v592_v37 = vmax.f32 %v590_v36, 0.0 }
 0x127   : > { %607 = vmatpush.msrb.mxu3 %v592_v37  ;;  %630 = vmatpush.msrb.mxu0 %v592_v37 }
 0x128   : > { %1101 = vmatmul.msk.f32.gmra.mxu1 %vm483_vm4, %v592_v37 }
 0x129   : > { %608 = vmatpush.msrb.mxu3 %v591_v31  ;;  %631 = vmatpush.msrb.mxu0 %v591_v31  ;;  %v970_v31 = vld [vmem:[%s1408_s9] sm:$0xff] }
 0x12a   : > { %1094 = vmatmul.msk.f32.vlgmr.msrb.gmra.mxu3 %vm421_vm0, %v1281_v9  ;;  %1096 = vmatmul.msk.f32.vlgmr.msrb.gmra.mxu0 %vm421_vm0, %v1284_v10 }
 0x12b   : > { %1106 = vmatpush.msk.msra.mxu3 %vm490_vm3, %v1105_v39 }
 0x12d   : > { %896 = vmatpush.msrb.mxu3 %v851_v3 }
 0x12f   : > { %897 = vmatpush.msrb.mxu3 %v850_v4 }
 0x131   : > { %898 = vmatpush.msrb.mxu3 %v849_v5 }
 0x132   : > { %1095 = vmatmul.msk.f32.gmra.mxu3 %vm421_vm0, %v414_v14  ;;  %1097 = vmatmul.msk.f32.gmra.mxu0 %vm421_vm0, %v420_v15  ;;  %v906_v14 = vld [vmem:[#allocation2 + $0x48] sm:$0xff]  ;;  %v905_v15 = vld [vmem:[#allocation2 + $0x40] sm:$0xff] }
 0x133   : > { %899 = vmatpush.msrb.mxu3 %v848_v11 }
 0x19c   : > { %v668_v44 = vpop.f32.mrf.mxu1 }
 0x1a5   : > { %v671_v49 = vpop.f32.mrf.mxu1 }
 0x1a7   : > { %v633_v40 = vpop.f32.mrf.mxu0 }
 0x1a8   : > { %1107 = vmatmul.msk.f32.vlgmr.msra.gmra.mxu3 %vm483_vm4, %v633_v40 }
 0x1ad   : > { %v610_v41 = vpop.f32.mrf.mxu3 }
 0x1ae   : > { %1103 = vmatmul.msk.f32.vlgmr.msra.gmra.mxu2 %vm483_vm4, %v610_v41 }
 0x1af   : > { %v636_v42 = vpop.f32.mrf.mxu0  ;;  %993 = vmatpush.msra.mxu2 %v973_v20 }
 0x1b0   : > { %1108 = vmatmul.msk.f32.gmra.mxu3 %vm483_vm4, %v636_v42 }
 0x1b1   : > { %994 = vmatpush.msra.mxu2 %v972_v21 }
 0x1b3   : > { %995 = vmatpush.msra.mxu2 %v971_v30 }
 0x1b5   : > { %v613_v43 = vpop.f32.mrf.mxu3  ;;  %996 = vmatpush.msra.mxu2 %v970_v31 }
 0x1b6   : > { %1104 = vmatmul.msk.f32.gmra.mxu2 %vm483_vm4, %v613_v43 }
 0x22b   : > { %v734_v45 = vpop.f32.mrf.mxu3 }
 0x231   : > { %v700_v46 = vpop.f32.mrf.mxu2 }
 0x232   : > { %v701_v47 = vadd.f32 %v700_v46, %v668_v44 }
 0x233   : > { %v737_v51 = vpop.f32.mrf.mxu3 }
 0x234   : > { %v740_v52 = vadd.f32 %v734_v45, %v701_v47 }
 0x236   : > { %v746_v57 = vadd.f32 %v1144_v53, %v740_v52 }
 0x238   : > { %v748_v60 = vmax.f32 %v746_v57, 0.0 }
 0x239   : > { %v703_v50 = vpop.f32.mrf.mxu2 }
 0x23a   : > { %v704_v54 = vadd.f32 %v703_v50, %v671_v49 }
 0x23c   : > { %v741_v56 = vadd.f32 %v737_v51, %v704_v54 }
 0x23e   : > { %v747_v58 = vadd.f32 %v1144_v53, %v741_v56 }
 0x240   : > { %v749_v59 = vmax.f32 %v747_v58, 0.0 }
 0x242   : > { %773 = vmatpush.msra.mxu0 %v749_v59  ;;  %796 = vmatpush.msra.mxu1 %v749_v59 }
 0x244   : > { %774 = vmatpush.msra.mxu0 %v748_v60  ;;  %797 = vmatpush.msra.mxu1 %v748_v60 }
 0x245   : > { %1109 = vmatmul.msk.f32.vlgmr.msra.gmra.mxu0 %vm421_vm0, %v752_v61  ;;  %1110 = vmatmul.msk.f32.vlgmr.msra.gmra.mxu1 %vm421_vm0, %v755_v62 }
 0x2c2   : > { %v776_v6 = vpop.f32.mrf.mxu0  ;;  %v799_v7 = vpop.f32.mrf.mxu1 }
 0x2c3   : > { %v802_v8 = vmax.f32 %v776_v6, %v799_v7 }
 0x2c5   : > { %821 = vmatpush.msrb.mxu0 %v802_v8  ;;  %843 = vmatpush.msrb.mxu1 %v802_v8 }
 0x2c6   : > { %1111 = vmatmul.msk.f32.vlgmr.msrb.gmra.mxu0 %vm803_vm9, %v1281_v9  ;;  %1113 = vmatmul.msk.f32.vlgmr.msrb.gmra.mxu2 %vm857_vm10, %v802_v8  ;;  %v942_v9 = vld [vmem:[%s1406_s7 + $0x18] sm:$0xff] }
 0x2c7   : > { %1112 = vmatmul.msk.f32.vlgmr.msrb.gmra.mxu1 %vm803_vm9, %v1284_v10  ;;  %924 = vmatpush.msra.mxu0 %v908_v12  ;;  %v941_v10 = vld [vmem:[%s1406_s7 + $0x10] sm:$0xff] }
 0x2c8   : > { %962 = vmatpush.msra.mxu1 %v942_v9 }
 0x2c9   : > { %925 = vmatpush.msra.mxu0 %v907_v13 }
 0x2ca   : > { %963 = vmatpush.msra.mxu1 %v941_v10 }
 0x2cb   : > { %926 = vmatpush.msra.mxu0 %v906_v14 }
 0x2cc   : > { %964 = vmatpush.msra.mxu1 %v940_v18 }
 0x2cd   : > { %927 = vmatpush.msra.mxu0 %v905_v15 }
 0x2ce   : > { %965 = vmatpush.msra.mxu1 %v939_v19 }
 0x343   : > { %v823_v16 = vpop.f32.mrf.mxu0 }
 0x344   : > { %1114 = vmatmul.msk.f32.vlgmr.msrb.gmra.mxu3 %vm857_vm10, %v823_v16  ;;  %v845_v17 = vpop.f32.mrf.mxu1 }
 0x345   : > { %1115 = vmatmul.msk.f32.vlgmr.msra.gmra.mxu0 %vm857_vm10, %v845_v17 }
 0x349   : > { %v878_v22 = vpop.f32.mrf.mxu2 }
 0x3c2   : > { %v929_v24 = vpop.f32.mrf.mxu0 }
 0x3c7   : > { %v901_v23 = vpop.f32.mrf.mxu3 }
 0x3c8   : > { %v902_v25 = vadd.f32 %v901_v23, %v878_v22 }
 0x3ca   : > { %v932_v27 = vadd.f32 %v929_v24, %v902_v25 }
 0x3cc   : > { %v937_v28 = vadd.f32 %v1145_v26, %v932_v27 }
 0x3ce   : > { %v938_v29 = vmax.f32 %v937_v28, 0.0 }
 0x3d0   : > { %1116 = vmatmul.msk.f32.vlgmr.msra.gmra.mxu1 %vm857_vm10, %v938_v29 }
 0x44d   : > { %v967_v33 = vpop.f32.mrf.mxu1 }
 0x44e   : > { %v968_v34 = vadd.f32 %v1146_v32, %v967_v33 }
 0x450   : > { %1117 = vmatmul.msk.f32.vlgmr.msra.gmra.mxu2 %vm857_vm10, %v968_v34 }
 0x4d3   : > { %v998_v36 = vpop.f32.mrf.mxu2 }
 0x4d4   : > { %v999_v37 = vadd.f32 %v1147_v35, %v998_v36 }
 0x4d6   : > { %1001 = vst.msk [vmem:[%s401_s19] sm:$0xff] %vm483_vm4, %v999_v37 }
 0x4d7 PF: > { %s22_s17 = sadd.s32 1, %s1188_s17  }
 0x4d8   : > { %p19_p7 = scmp.ge.s32.totalorder %s22_s17, 4  }
 0x4da   :  { %21 = sbr.rel (!%p19_p7) target bundleno = 1 (0x1), region = 105 }
 0x4df   :  { %1021 = vsyncpa [#allocation3], 1 }
 0x4e0   :  { %1023 = vsyncpa [#allocation3 + $0x1], 1 }

</bundles_post_ra>
